<compile_context>
chip_gen: v7x
topology: tpu7x:2x2x1
jax: 0.10.0
libtpu: 0.0.40
codegen_flags: <defaults>
</compile_context>

<pallas_src>
import functools

import jax
import jax.numpy as jnp
from jax.experimental import pallas as pl
from jax.experimental.pallas import tpu as pltpu

_LANE = 128
_SUB = 8
_BLOCK_BOXES = 32768  # boxes per grid step when N is very large (256 x 128)


def _round_up(x, m):
    return (x + m - 1) // m * m


def _iou_loss_kernel(data_ref, *rest, loc_loss_type, has_weight, n_valid, blk_boxes):
    if has_weight:
        w_ref, out_ref = rest
    else:
        (out_ref,) = rest

    i = pl.program_id(0)

    def row(r):
        return data_ref[r].astype(jnp.float32)  # (r_blk, 128), dense

    pred_left, pred_top, pred_right, pred_bottom = row(0), row(1), row(2), row(3)
    target_left, target_top, target_right, target_bottom = row(4), row(5), row(6), row(7)

    pred_area = (pred_left + pred_right) * (pred_top + pred_bottom)
    target_area = (target_left + target_right) * (target_top + target_bottom)

    w_intersect = jnp.minimum(pred_left, target_left) + jnp.minimum(pred_right, target_right)
    g_w_intersect = jnp.maximum(pred_left, target_left) + jnp.maximum(pred_right, target_right)
    h_intersect = jnp.minimum(pred_bottom, target_bottom) + jnp.minimum(pred_top, target_top)
    g_h_intersect = jnp.maximum(pred_bottom, target_bottom) + jnp.maximum(pred_top, target_top)

    ac_union = g_w_intersect * g_h_intersect + 1e-7
    area_intersect = w_intersect * h_intersect
    area_union = target_area + pred_area - area_intersect

    ious = (area_intersect + 1.0) / (area_union + 1.0)
    gious = ious - (ac_union - area_union) / ac_union

    if loc_loss_type == "iou":
        losses = -jnp.log(ious)
    elif loc_loss_type == "linear_iou":
        losses = 1.0 - ious
    elif loc_loss_type == "giou":
        losses = 1.0 - gious
    else:
        raise NotImplementedError(loc_loss_type)

    # In-kernel validity mask (zero-padded lanes beyond n_valid boxes).
    shape = losses.shape
    row_idx = jax.lax.broadcasted_iota(jnp.int32, shape, 0)
    lane_idx = jax.lax.broadcasted_iota(jnp.int32, shape, 1)
    global_idx = i * blk_boxes + row_idx * _LANE + lane_idx
    valid = (global_idx < n_valid).astype(jnp.float32)
    losses = losses * valid

    @pl.when(i == 0)
    def _():
        out_ref[0, 0] = 0.0
        out_ref[0, 1] = 0.0
        out_ref[0, 2] = 0.0
        out_ref[0, 3] = 0.0

    out_ref[0, 0] = out_ref[0, 0] + jnp.sum(losses)
    if has_weight:
        w = w_ref[...]  # zero-padded on host, no extra masking needed
        out_ref[0, 1] = out_ref[0, 1] + jnp.sum(losses * w)
        out_ref[0, 2] = out_ref[0, 2] + jnp.sum(w)


def iou_loss(pred, target, weight=None, *, loc_loss_type="giou", bf16_inputs=False):
    """pred, target: [N, 4]; weight: optional [N].  Returns a scalar loss."""
    n = pred.shape[0]
    assert n != 0
    pred = pred.astype(jnp.float32)
    target = target.astype(jnp.float32)

    if n <= _BLOCK_BOXES:
        blk = _round_up(n, _SUB * _LANE)  # single block, multiple of 1024 boxes
        n_pad = blk
    else:
        blk = _BLOCK_BOXES
        n_pad = _round_up(n, _BLOCK_BOXES)
    r_total = n_pad // _LANE
    r_blk = blk // _LANE
    grid = (n_pad // blk,)

    # One sublane-dense slab: (8, n) -> pad -> (8, R, 128).
    packed = jnp.concatenate([pred.T, target.T], axis=0)
    packed = jnp.pad(packed, ((0, 0), (0, n_pad - n)))
    packed = packed.reshape(8, r_total, _LANE)
    if bf16_inputs:
        packed = packed.astype(jnp.bfloat16)

    has_weight = weight is not None
    inputs = [packed]
    in_specs = [pl.BlockSpec((8, r_blk, _LANE), lambda i: (0, i, 0))]
    if has_weight:
        w = jnp.pad(weight.astype(jnp.float32), (0, n_pad - n)).reshape(r_total, _LANE)
        inputs.append(w)
        in_specs.append(pl.BlockSpec((r_blk, _LANE), lambda i: (i, 0)))

    kernel = functools.partial(
        _iou_loss_kernel,
        loc_loss_type=loc_loss_type,
        has_weight=has_weight,
        n_valid=n,
        blk_boxes=blk,
    )

    sums = pl.pallas_call(
        kernel,
        out_shape=jax.ShapeDtypeStruct((1, 4), jnp.float32),
        grid_spec=pltpu.PrefetchScalarGridSpec(
            num_scalar_prefetch=0,
            grid=grid,
            in_specs=in_specs,
            out_specs=pl.BlockSpec((1, 4), lambda i: (0, 0), memory_space=pltpu.SMEM),
        ),
        compiler_params=pltpu.CompilerParams(dimension_semantics=("arbitrary",)),
    )(*inputs)

    sum_l = sums[0, 0]
    if has_weight:
        sum_lw = sums[0, 1]
        sum_w = sums[0, 2]
        # Guard denominator so the discarded branch never produces NaN.
        return jnp.where(sum_w > 0, sum_lw / jnp.maximum(sum_w, 1e-12), sum_l / n)
    return sum_l / n


def _ref_iou_loss(pred, target, weight=None, loc_loss_type="giou"):
    pl_, pt, pr, pb = pred[:, 0], pred[:, 1], pred[:, 2], pred[:, 3]
    tl, tt, tr, tb = target[:, 0], target[:, 1], target[:, 2], target[:, 3]
    pa = (pl_ + pr) * (pt + pb)
    ta = (tl + tr) * (tt + tb)
    wi = jnp.minimum(pl_, tl) + jnp.minimum(pr, tr)
    gwi = jnp.maximum(pl_, tl) + jnp.maximum(pr, tr)
    hi = jnp.minimum(pb, tb) + jnp.minimum(pt, tt)
    ghi = jnp.maximum(pb, tb) + jnp.maximum(pt, tt)
    ac = gwi * ghi + 1e-7
    ai = wi * hi
    au = ta + pa - ai
    ious = (ai + 1.0) / (au + 1.0)
    gious = ious - (ac - au) / ac
    if loc_loss_type == "iou":
        losses = -jnp.log(ious)
    elif loc_loss_type == "linear_iou":
        losses = 1.0 - ious
    else:
        losses = 1.0 - gious
    if weight is not None and jnp.sum(weight) > 0:
        return jnp.sum(losses * weight) / jnp.sum(weight)
    return jnp.mean(losses)


if __name__ == "__main__":
    key = jax.random.PRNGKey(0)
    k1, k2, k3 = jax.random.split(key, 3)
    N = 200  # small, non-multiple-of-128 box count to exercise padding/masking
    # distances to box edges are non-negative
    pred = jax.random.uniform(k1, (N, 4), jnp.float32, minval=0.1, maxval=5.0)
    target = jax.random.uniform(k2, (N, 4), jnp.float32, minval=0.1, maxval=5.0)
    weight = jax.random.uniform(k3, (N,), jnp.float32, minval=0.0, maxval=1.0)

    ok = True
    for lt in ("iou", "linear_iou", "giou"):
        out_w = jax.block_until_ready(iou_loss(pred, target, weight, loc_loss_type=lt))
        out_u = jax.block_until_ready(iou_loss(pred, target, None, loc_loss_type=lt))
        ref_w = _ref_iou_loss(pred, target, weight, lt)
        ref_u = _ref_iou_loss(pred, target, None, lt)
        ok &= bool(jnp.allclose(out_w, ref_w, rtol=1e-5, atol=1e-5))
        ok &= bool(jnp.allclose(out_u, ref_u, rtol=1e-5, atol=1e-5))

    # Optional bf16-streaming path: just verify it runs and is finite.
    out_bf16 = jax.block_until_ready(
        iou_loss(pred, target, weight, loc_loss_type="giou", bf16_inputs=True)
    )
    ok &= bool(jnp.isfinite(out_bf16))

    if not ok:
        raise AssertionError("Pallas IOULoss does not match reference")
    print("KERNEL_OK")
</pallas_src>

<mosaic_0001>
module attributes {stable_mosaic.version = 11 : i64} {
  func.func @_iou_loss_kernel(%arg0: i32, %arg1: memref<8x8x128xf32, #tpu.memory_space<vmem>>, %arg2: memref<8x128xf32, #tpu.memory_space<vmem>>, %arg3: memref<1x4xf32, #tpu.memory_space<smem>>) attributes {dimension_semantics = [#tpu.dimension_semantics<arbitrary>], iteration_bounds = array<i64: 1>, scalar_prefetch = 0 : i64, scratch_operands = 0 : i64, tpu.core_type = #tpu.core_type<tc>, window_params = [{transform_indices = @transform_0, window_bounds = array<i64: 8, 8, 128>}, {transform_indices = @transform_1, window_bounds = array<i64: 8, 128>}, {transform_indices = @transform_2, window_bounds = array<i64: 1, 4>}]} {
    %c0 = arith.constant 0 : index
    %c0_0 = arith.constant 0 : index
    %c0_1 = arith.constant 0 : index
    %0 = vector.load %arg1[%c0, %c0_0, %c0_1] : memref<8x8x128xf32, #tpu.memory_space<vmem>>, vector<1x8x128xf32>
    %1 = vector.shape_cast %0 : vector<1x8x128xf32> to vector<8x128xf32>
    %c1 = arith.constant 1 : index
    %c0_2 = arith.constant 0 : index
    %c0_3 = arith.constant 0 : index
    %2 = vector.load %arg1[%c1, %c0_2, %c0_3] : memref<8x8x128xf32, #tpu.memory_space<vmem>>, vector<1x8x128xf32>
    %3 = vector.shape_cast %2 : vector<1x8x128xf32> to vector<8x128xf32>
    %c2 = arith.constant 2 : index
    %c0_4 = arith.constant 0 : index
    %c0_5 = arith.constant 0 : index
    %4 = vector.load %arg1[%c2, %c0_4, %c0_5] : memref<8x8x128xf32, #tpu.memory_space<vmem>>, vector<1x8x128xf32>
    %5 = vector.shape_cast %4 : vector<1x8x128xf32> to vector<8x128xf32>
    %c3 = arith.constant 3 : index
    %c0_6 = arith.constant 0 : index
    %c0_7 = arith.constant 0 : index
    %6 = vector.load %arg1[%c3, %c0_6, %c0_7] : memref<8x8x128xf32, #tpu.memory_space<vmem>>, vector<1x8x128xf32>
    %7 = vector.shape_cast %6 : vector<1x8x128xf32> to vector<8x128xf32>
    %c4 = arith.constant 4 : index
    %c0_8 = arith.constant 0 : index
    %c0_9 = arith.constant 0 : index
    %8 = vector.load %arg1[%c4, %c0_8, %c0_9] : memref<8x8x128xf32, #tpu.memory_space<vmem>>, vector<1x8x128xf32>
    %9 = vector.shape_cast %8 : vector<1x8x128xf32> to vector<8x128xf32>
    %c5 = arith.constant 5 : index
    %c0_10 = arith.constant 0 : index
    %c0_11 = arith.constant 0 : index
    %10 = vector.load %arg1[%c5, %c0_10, %c0_11] : memref<8x8x128xf32, #tpu.memory_space<vmem>>, vector<1x8x128xf32>
    %11 = vector.shape_cast %10 : vector<1x8x128xf32> to vector<8x128xf32>
    %c6 = arith.constant 6 : index
    %c0_12 = arith.constant 0 : index
    %c0_13 = arith.constant 0 : index
    %12 = vector.load %arg1[%c6, %c0_12, %c0_13] : memref<8x8x128xf32, #tpu.memory_space<vmem>>, vector<1x8x128xf32>
    %13 = vector.shape_cast %12 : vector<1x8x128xf32> to vector<8x128xf32>
    %c7 = arith.constant 7 : index
    %c0_14 = arith.constant 0 : index
    %c0_15 = arith.constant 0 : index
    %14 = vector.load %arg1[%c7, %c0_14, %c0_15] : memref<8x8x128xf32, #tpu.memory_space<vmem>>, vector<1x8x128xf32>
    %15 = vector.shape_cast %14 : vector<1x8x128xf32> to vector<8x128xf32>
    %16 = arith.addf %1, %5 : vector<8x128xf32>
    %17 = arith.addf %3, %7 : vector<8x128xf32>
    %18 = arith.mulf %16, %17 : vector<8x128xf32>
    %19 = arith.addf %9, %13 : vector<8x128xf32>
    %20 = arith.addf %11, %15 : vector<8x128xf32>
    %21 = arith.mulf %19, %20 : vector<8x128xf32>
    %22 = arith.minimumf %1, %9 : vector<8x128xf32>
    %23 = arith.minimumf %5, %13 : vector<8x128xf32>
    %24 = arith.addf %22, %23 : vector<8x128xf32>
    %25 = arith.minimumf %7, %15 : vector<8x128xf32>
    %26 = arith.minimumf %3, %11 : vector<8x128xf32>
    %27 = arith.addf %25, %26 : vector<8x128xf32>
    %28 = arith.mulf %24, %27 : vector<8x128xf32>
    %29 = arith.addf %21, %18 : vector<8x128xf32>
    %30 = arith.subf %29, %28 : vector<8x128xf32>
    %cst = arith.constant 1.000000e+00 : f32
    %31 = vector.broadcast %cst : f32 to vector<8x128xf32>
    %32 = arith.addf %28, %31 : vector<8x128xf32>
    %cst_16 = arith.constant 1.000000e+00 : f32
    %33 = vector.broadcast %cst_16 : f32 to vector<8x128xf32>
    %34 = arith.addf %30, %33 : vector<8x128xf32>
    %35 = arith.divf %32, %34 : vector<8x128xf32>
    %36 = math.log %35 : vector<8x128xf32>
    %cst_17 = arith.constant 0.000000e+00 : f32
    %37 = vector.broadcast %cst_17 : f32 to vector<8x128xf32>
    %38 = arith.subf %37, %36 : vector<8x128xf32>
    %39 = tpu.iota {dimensions = array<i32: 0>} : vector<8x128xi32>
    %40 = tpu.iota {dimensions = array<i32: 1>} : vector<8x128xi32>
    %c1024_i32 = arith.constant 1024 : i32
    %41 = arith.muli %arg0, %c1024_i32 : i32
    %c128_i32 = arith.constant 128 : i32
    %42 = vector.broadcast %c128_i32 : i32 to vector<8x128xi32>
    %43 = arith.muli %39, %42 : vector<8x128xi32>
    %44 = vector.broadcast %41 : i32 to vector<8x128xi32>
    %45 = arith.addi %44, %43 : vector<8x128xi32>
    %46 = arith.addi %45, %40 : vector<8x128xi32>
    %c200_i32 = arith.constant 200 : i32
    %47 = vector.broadcast %c200_i32 : i32 to vector<8x128xi32>
    %48 = arith.cmpi slt, %46, %47 : vector<8x128xi32>
    %49 = arith.extui %48 : vector<8x128xi1> to vector<8x128xi32>
    %50 = arith.sitofp %49 : vector<8x128xi32> to vector<8x128xf32>
    %51 = arith.mulf %38, %50 : vector<8x128xf32>
    %c0_i32 = arith.constant 0 : i32
    %52 = arith.cmpi eq, %arg0, %c0_i32 : i32
    %53 = arith.extui %52 : i1 to i32
    %c0_i32_18 = arith.constant 0 : i32
    %54 = arith.cmpi ne, %53, %c0_i32_18 : i32
    scf.if %54 {
      %cst_36 = arith.constant 0.000000e+00 : f32
      %c0_37 = arith.constant 0 : index
      %c0_38 = arith.constant 0 : index
      %78 = memref.load %arg3[%c0_37, %c0_38] : memref<1x4xf32, #tpu.memory_space<smem>>
      memref.store %cst_36, %arg3[%c0_37, %c0_38] : memref<1x4xf32, #tpu.memory_space<smem>>
      %cst_39 = arith.constant 0.000000e+00 : f32
      %c0_40 = arith.constant 0 : index
      %c1_41 = arith.constant 1 : index
      %79 = memref.load %arg3[%c0_40, %c1_41] : memref<1x4xf32, #tpu.memory_space<smem>>
      memref.store %cst_39, %arg3[%c0_40, %c1_41] : memref<1x4xf32, #tpu.memory_space<smem>>
      %cst_42 = arith.constant 0.000000e+00 : f32
      %c0_43 = arith.constant 0 : index
      %c2_44 = arith.constant 2 : index
      %80 = memref.load %arg3[%c0_43, %c2_44] : memref<1x4xf32, #tpu.memory_space<smem>>
      memref.store %cst_42, %arg3[%c0_43, %c2_44] : memref<1x4xf32, #tpu.memory_space<smem>>
      %cst_45 = arith.constant 0.000000e+00 : f32
      %c0_46 = arith.constant 0 : index
      %c3_47 = arith.constant 3 : index
      %81 = memref.load %arg3[%c0_46, %c3_47] : memref<1x4xf32, #tpu.memory_space<smem>>
      memref.store %cst_45, %arg3[%c0_46, %c3_47] : memref<1x4xf32, #tpu.memory_space<smem>>
    } else {
    }
    %c0_19 = arith.constant 0 : index
    %c0_20 = arith.constant 0 : index
    %55 = memref.load %arg3[%c0_19, %c0_20] : memref<1x4xf32, #tpu.memory_space<smem>>
    %56 = vector.shape_cast %51 : vector<8x128xf32> to vector<1x8x128xf32>
    %cst_21 = arith.constant dense<0.000000e+00> : vector<1xf32>
    %57 = vector.multi_reduction <add>, %56, %cst_21 [1, 2] : vector<1x8x128xf32> to vector<1xf32>
    %58 = vector.shape_cast %57 : vector<1xf32> to vector<1x1x1xf32>
    %59 = vector.extract %58[0, 0, 0] : f32 from vector<1x1x1xf32>
    %60 = arith.addf %55, %59 : f32
    %c0_22 = arith.constant 0 : index
    %c0_23 = arith.constant 0 : index
    %61 = memref.load %arg3[%c0_22, %c0_23] : memref<1x4xf32, #tpu.memory_space<smem>>
    memref.store %60, %arg3[%c0_22, %c0_23] : memref<1x4xf32, #tpu.memory_space<smem>>
    %c0_24 = arith.constant 0 : index
    %c0_25 = arith.constant 0 : index
    %62 = vector.load %arg2[%c0_24, %c0_25] : memref<8x128xf32, #tpu.memory_space<vmem>>, vector<8x128xf32>
    %c0_26 = arith.constant 0 : index
    %c1_27 = arith.constant 1 : index
    %63 = memref.load %arg3[%c0_26, %c1_27] : memref<1x4xf32, #tpu.memory_space<smem>>
    %64 = arith.mulf %51, %62 : vector<8x128xf32>
    %65 = vector.shape_cast %64 : vector<8x128xf32> to vector<1x8x128xf32>
    %cst_28 = arith.constant dense<0.000000e+00> : vector<1xf32>
    %66 = vector.multi_reduction <add>, %65, %cst_28 [1, 2] : vector<1x8x128xf32> to vector<1xf32>
    %67 = vector.shape_cast %66 : vector<1xf32> to vector<1x1x1xf32>
    %68 = vector.extract %67[0, 0, 0] : f32 from vector<1x1x1xf32>
    %69 = arith.addf %63, %68 : f32
    %c0_29 = arith.constant 0 : index
    %c1_30 = arith.constant 1 : index
    %70 = memref.load %arg3[%c0_29, %c1_30] : memref<1x4xf32, #tpu.memory_space<smem>>
    memref.store %69, %arg3[%c0_29, %c1_30] : memref<1x4xf32, #tpu.memory_space<smem>>
    %c0_31 = arith.constant 0 : index
    %c2_32 = arith.constant 2 : index
    %71 = memref.load %arg3[%c0_31, %c2_32] : memref<1x4xf32, #tpu.memory_space<smem>>
    %72 = vector.shape_cast %62 : vector<8x128xf32> to vector<1x8x128xf32>
    %cst_33 = arith.constant dense<0.000000e+00> : vector<1xf32>
    %73 = vector.multi_reduction <add>, %72, %cst_33 [1, 2] : vector<1x8x128xf32> to vector<1xf32>
    %74 = vector.shape_cast %73 : vector<1xf32> to vector<1x1x1xf32>
    %75 = vector.extract %74[0, 0, 0] : f32 from vector<1x1x1xf32>
    %76 = arith.addf %71, %75 : f32
    %c0_34 = arith.constant 0 : index
    %c2_35 = arith.constant 2 : index
    %77 = memref.load %arg3[%c0_34, %c2_35] : memref<1x4xf32, #tpu.memory_space<smem>>
    memref.store %76, %arg3[%c0_34, %c2_35] : memref<1x4xf32, #tpu.memory_space<smem>>
    return
  }
  func.func @transform_0(%arg0: i32) -> (i32, i32, i32) {
    %c0_i32 = arith.constant 0 : i32
    %c0_i32_0 = arith.constant 0 : i32
    %c0_i32_1 = arith.constant 0 : i32
    return %c0_i32, %arg0, %c0_i32_0 : i32, i32, i32
  }
  func.func @transform_1(%arg0: i32) -> (i32, i32) {
    %c0_i32 = arith.constant 0 : i32
    %c0_i32_0 = arith.constant 0 : i32
    return %arg0, %c0_i32 : i32, i32
  }
  func.func @transform_2(%arg0: i32) -> (i32, i32) {
    %c0_i32 = arith.constant 0 : i32
    %c0_i32_0 = arith.constant 0 : i32
    %c0_i32_1 = arith.constant 0 : i32
    return %c0_i32, %c0_i32_0 : i32, i32
  }
}

</mosaic_0001>

<bundles_post_ra>
// kernel: tpu_custom_call.1
= control target key start
LH: loop header
LB: loop body
LE: loop exit
PB: predicated region body
PF: predicated region fallthrough
CT: control target
= control target key end

     0   :  { %7 = vsyncpa [#allocation3], 0  ;;  %s294_s0 = inlined_call_operand.hbm [shape: f32[8,8,128], index: 0, kind: input, shape index: {}]   ;;  %s295_s1 = inlined_call_operand.hbm [shape: f32[8,128], index: 1, kind: input, shape index: {}]   ;;  %s296_s2 = inlined_call_operand.hbm [shape: f32[1,4], index: 2, kind: output, shape index: {}]  }
   0x1   :  { %8 = vsyncpa [#allocation6], 0 }
   0x2   :  { %9 = vsyncpa [#allocation4], 0  ;;  %s236_s9 = smov [#allocation2]   ;;  %s176_s13 = scalar_lea.hbm %s294_s0, 1024 }
   0x3   :  { %s15_s10 = sshll.u32 %s236_s9, 4  ;;  %p177_p0 = scmp.ne.s32.totalorder %s294_s0, %s176_s13  ;;  %s16_s10 = int_to_ptr.vmem [resolvable:$true] %s15_s10 }
   0x4   :  { %p180_p1 = scmp.lt.u32.totalorder %s176_s13, %s294_s0 }
   0x6   :  { %p182_p2 = pnand %p180_p1, %p177_p0 }
   0x8   :  { %185 = shalt.err (!%p182_p2)
}
   0x9   :  { %s186_s18 = scalar_lea.vmem %s16_s10, 1024  ;;  %p191_p4 = scmp.lt.s32.totalorder %s16_s10, %s16_s10 }
   0xa   :  { %p187_p3 = scmp.ne.s32.totalorder %s16_s10, %s186_s18  ;;  %p192_p5 = scmp.lt.s32.totalorder %s186_s18, %s186_s18 }
   0xc   :  { %p193_p6 = por %p192_p5, %p191_p4 }
   0xe   :  { %p194_p7 = pnand %p193_p6, %p187_p3 }
  0x10   :  { %197 = shalt.err (!%p194_p7)
}
  0x11   :  { %s237_s19 = smov 128   ;;  %s238_s20 = smov 8  }
  0x12   :  { %21 = dma.hbm_to_vmem [thread:$0]  %s294_s0, 1024, %s16_s10, [#allocation3], %s237_s19, %s237_s19, %s238_s20  }
  0x13   :  { %s239_s23 = smov [#allocation5]   ;;  %s198_s27 = scalar_lea.hbm %s295_s1, 128 }
  0x14   :  { %s28_s24 = sshll.u32 %s239_s23, 4  ;;  %p199_p8 = scmp.ne.s32.totalorder %s295_s1, %s198_s27  ;;  %s29_s24 = int_to_ptr.vmem [resolvable:$true] %s28_s24 }
  0x15   :  { %p202_p9 = scmp.lt.u32.totalorder %s198_s27, %s295_s1 }
  0x17   :  { %p204_p10 = pnand %p202_p9, %p199_p8 }
  0x19   :  { %207 = shalt.err (!%p204_p10)
}
  0x1a   :  { %s208_s4 = scalar_lea.vmem %s29_s24, 128  ;;  %p213_p12 = scmp.lt.s32.totalorder %s29_s24, %s29_s24 }
  0x1b   :  { %p209_p11 = scmp.ne.s32.totalorder %s29_s24, %s208_s4  ;;  %p214_p13 = scmp.lt.s32.totalorder %s208_s4, %s208_s4 }
  0x1d   :  { %p215_p0 = por %p214_p13, %p213_p12 }
  0x1f   :  { %p216_p1 = pnand %p215_p0, %p209_p11 }
  0x21   :  { %219 = shalt.err (!%p216_p1)
}
  0x22   :  { %31 = dma.hbm_to_vmem [thread:$0]  %s295_s1, 128, %s29_s24, [#allocation6]  }
  0x23   :  { %230 = dma.done.wait [#allocation3], 1024  }
  0x24   :  { %231 = vsyncadd [#allocation3], 4294966272 }
  0x25   :  { %232 = dma.done.wait [#allocation6], 128  }
  0x26   :  { %233 = vsyncadd [#allocation6], 4294967168  ;;  %v113_v0 = vld [vmem:[#allocation5] sm:$0xff]  ;;  %v40_v2 = vld [vmem:[#allocation2 + $0x8] sm:$0xff]  ;;  %v75_v25 = vlaneseq  ;;  %v240_v35 = vmov 0.0   ;;  %s241_s1 = smov 0.0  }
  0x27   :  { %v38_v1 = vld [vmem:[#allocation2] sm:$0xff]  ;;  %129 = vadd.xlane.f32.xlu1 %v113_v0  ;;  %v42_v3 = vld [vmem:[#allocation2 + $0x10] sm:$0xff]  ;;  %v44_v4 = vld [vmem:[#allocation2 + $0x18] sm:$0xff]  ;;  %99 = sst [smem:[#allocation7 + $0x3]] %s241_s1  ;;  %s220_s11 = scalar_lea.hbm %s296_s2, 16 }
  0x28   :  { %v46_v5 = vld [vmem:[#allocation2 + $0x20] sm:$0xff]  ;;  %v48_v6 = vld [vmem:[#allocation2 + $0x28] sm:$0xff]  ;;  %v50_v7 = vld [vmem:[#allocation2 + $0x30] sm:$0xff]  ;;  %v53_v9 = vadd.f32 %v42_v3, %v38_v1  ;;  %v54_v10 = vadd.f32 %v44_v4, %v40_v2  ;;  %v76_v28 = vshrl.u32 %v75_v25, 7  ;;  %v78_v30 = vand.u32 127, %v75_v25  ;;  %p221_p2 = scmp.ne.s32.totalorder %s296_s2, %s220_s11  ;;  %p224_p3 = scmp.lt.u32.totalorder %s220_s11, %s296_s2 }
  0x29   :  { %v52_v8 = vld [vmem:[#allocation2 + $0x38] sm:$0xff]  ;;  %v59_v11 = vmin.f32 %v38_v1, %v46_v5  ;;  %v56_v12 = vadd.f32 %v50_v7, %v46_v5  ;;  %v60_v14 = vmin.f32 %v42_v3, %v50_v7  ;;  %v63_v17 = vmin.f32 %v40_v2, %v48_v6 }
  0x2a   :  { %v57_v13 = vadd.f32 %v52_v8, %v48_v6  ;;  %v62_v15 = vmin.f32 %v44_v4, %v52_v8  ;;  %v55_v16 = vmul.f32 %v54_v10, %v53_v9  ;;  %v80_v31 = vmul.u32 128, %v76_v28  ;;  %p226_p4 = pnand %p224_p3, %p221_p2 }
  0x2b   :  { %v61_v19 = vadd.f32 %v60_v14, %v59_v11 }
  0x2c   :  { %v58_v18 = vmul.f32 %v57_v13, %v56_v12  ;;  %v64_v20 = vadd.f32 %v63_v17, %v62_v15  ;;  %v83_v32 = vadd.s32 %v80_v31, %v78_v30 }
  0x2e   :  { %v66_v21 = vadd.f32 %v58_v18, %v55_v16  ;;  %v65_v22 = vmul.f32 %v64_v20, %v61_v19  ;;  %vm84_vm0 = vcmp.lt.s32.totalorder %v83_v32, 200 }
  0x2f   :  { %v156_v36 = vsel %vm84_vm0, 1.0, %v240_v35 }
  0x30   :  { %v67_v23 = vsub.f32 %v66_v21, %v65_v22  ;;  %v68_v26 = vadd.f32 1.0, %v65_v22 }
  0x32   :  { %v69_v24 = vadd.f32 1.0, %v67_v23 }
  0x34   :  { %172 = vrcp.f32 %v69_v24 }
  0x3e   :  { %v173_v27 = vpop.eup %172 }
  0x3f   :  { %v71_v29 = vmul.f32 %v173_v27, %v68_v26 }
  0x41   :  { %174 = vlog2.f32 %v71_v29 }
  0x4b   :  { %v175_v33 = vpop.eup %174 }
  0x4c   :  { %v73_v34 = vmul.f32 0.6931472, %v175_v33 }
  0x4e   :  { %v74_v37 = vsub.f32 0.0, %v73_v34 }
  0x50   :  { %v87_v38 = vmul.f32 %v156_v36, %v74_v37 }
  0x52   :  { %101 = vadd.xlane.f32.xlu0 %v87_v38  ;;  %v115_v39 = vmul.f32 %v113_v0, %v87_v38 }
  0x56   :  { %116 = vadd.xlane.f32.xlu0 %v115_v39 }
  0xb4   :  { %v130_v40 = vpop.xlane.xlu1 %129 }
  0xb5   :  { %v131_v41 = vrot.slane %v130_v40, 4 }
  0xb7   :  { %v132_v42 = vadd.f32 %v131_v41, %v130_v40 }
  0xb9   :  { %v133_v46 = vrot.slane %v132_v42, 2 }
  0xbb   :  { %v134_v52 = vadd.f32 %v133_v46, %v132_v42 }
  0xbd   :  { %v135_v57 = vrot.slane %v134_v52, 1 }
  0xbf   :  { %v136_v60 = vadd.f32 %v135_v57, %v134_v52 }
  0xdf   :  { %v102_v43 = vpop.xlane.xlu0 %101 }
  0xe0   :  { %v103_v44 = vrot.slane %v102_v43, 4 }
  0xe2   :  { %v104_v45 = vadd.f32 %v103_v44, %v102_v43 }
  0xe3   :  { %v117_v47 = vpop.xlane.xlu0 %116 }
  0xe4   :  { %v105_v48 = vrot.slane %v104_v45, 2  ;;  %v118_v49 = vrot.slane %v117_v47, 4 }
  0xe6   :  { %v119_v50 = vadd.f32 %v118_v49, %v117_v47  ;;  %v106_v51 = vadd.f32 %v105_v48, %v104_v45 }
  0xe8   :  { %v120_v53 = vrot.slane %v119_v50, 2  ;;  %v107_v54 = vrot.slane %v106_v51, 1 }
  0xea   :  { %v121_v55 = vadd.f32 %v120_v53, %v119_v50  ;;  %v108_v56 = vadd.f32 %v107_v54, %v106_v51 }
  0xec   :  { %159 = vpush %v108_v56  ;;  %v122_v58 = vrot.slane %v121_v55, 1 }
  0xee   :  { %v123_v59 = vadd.f32 %v122_v58, %v121_v55 }
  0xf0   :  { %161 = vpush %v123_v59 }
  0xf1   :  { %163 = vpush %v136_v60 }
 0x11d   :  { %s160_s6 = spop %159 }
 0x11e   :  { %112 = sst [smem:[#allocation7]] %s160_s6 }
 0x121   :  { %s162_s7 = spop %161 }
 0x122   :  { %s164_s8 = spop %163  ;;  %127 = sst [smem:[#allocation7 + $0x1]] %s162_s7 }
 0x123   :  { %140 = sst [smem:[#allocation7 + $0x2]] %s164_s8 }
 0x124   :  { %229 = shalt.err (!%p226_p4)
}
 0x125   :  { %s242_s16 = smov [#allocation7]  }
 0x126   :  { %148 = dma.smem_to_hbm %s242_s16, 16, %s296_s2, [#allocation4]  }
 0x127   :  { %234 = dma.done.wait [#allocation4], 16  }
 0x128   :  { %235 = vsyncadd [#allocation4], 4294967280 }
 0x129   :  { %152 = sfence }
 0x12a   :  { %153 = vsyncpa [#allocation3], 1 }
 0x12b   :  { %154 = vsyncpa [#allocation6], 1 }
 0x12c   :  { %155 = vsyncpa [#allocation4], 1 }

</bundles_post_ra>
